<compile_context>
chip_gen: v6e
topology: v6e:2x2x1
jax: 0.10.0
libtpu: 0.0.40
codegen_flags: <defaults>
</compile_context>

<pallas_src>
import jax
import jax.numpy as jnp
from jax.experimental import pallas as pl
from jax.experimental.pallas import tpu as pltpu

_LANE = 128
_TARGET_BLOCK_BYTES = 4 << 20     # ~4 MiB blocks (review: sweep 2-8 MiB; keep <=4-6 MiB for v7x)
_RAGGED_CHUNK_BYTES = 256 << 10   # lane-chunk size for the non-128-divisible path
_VMEM_LIMIT_BYTES = 32 << 20      # >= 2 arrays * 2 buffers * 4 MiB + headroom; < v7x's 64 MiB


def _identity_copy_kernel(x_ref, o_ref):
    # Whole-tile load/store: the "compute" of IdentityFirstStage.forward.
    o_ref[...] = x_ref[...]


def _sublane(itemsize):
    # Native sublane packing: f32=8, bf16=16, int8/fp8=32.
    return max(8, 32 // itemsize)


def _choose_2d_layout(n, itemsize):
    """(R, C, rows_per_block) for a lane-dense copy; requires n % 128 == 0."""
    sub = _sublane(itemsize)
    divisors = [c for c in (8192, 4096, 2048, 1024, 512, 256, 128) if n % c == 0]
    # Widest lane extent that still leaves at least one full sublane tile of rows.
    C = next((c for c in divisors if n // c >= sub), divisors[0])
    R = n // C
    rows = _TARGET_BLOCK_BYTES // (C * itemsize)
    rows = max(sub, (rows // sub) * sub)
    # v7x megacore: keep >= 2 grid steps for tensors spanning >= 2 sublane tiles
    # so dimension_semantics=("parallel",) can give both TensorCores work.
    if R >= 2 * sub:
        rows = min(rows, max(sub, ((R // 2) // sub) * sub))
    rows = min(rows, R)
    return R, C, rows


def _pallas_copy_2d(x2d, rows, *, alias_input):
    R, C = x2d.shape
    nbytes = x2d.size * x2d.dtype.itemsize
    spec = pl.BlockSpec((rows, C), lambda i: (i, 0))
    return pl.pallas_call(
        _identity_copy_kernel,
        out_shape=jax.ShapeDtypeStruct((R, C), x2d.dtype),
        grid_spec=pltpu.PrefetchScalarGridSpec(
            num_scalar_prefetch=0,
            grid=(pl.cdiv(R, rows),),
            in_specs=[spec],
            out_specs=spec,
        ),
        input_output_aliases={0: 0} if alias_input else {},
        cost_estimate=pl.CostEstimate(
            flops=0, transcendentals=0, bytes_accessed=2 * nbytes),
        compiler_params=pltpu.CompilerParams(
            dimension_semantics=("parallel",),
            vmem_limit_bytes=_VMEM_LIMIT_BYTES,
        ),
    )(x2d)


def _pallas_copy_ragged(x1d, *, alias_input):
    """Copy of a flat array whose length is not a multiple of 128.

    Streamed as bounded (1, chunk) lane tiles instead of one unbounded (1, n)
    block, so large ragged tensors cannot VMEM-OOM.
    """
    # TODO(synk): (1, chunk) tiles pay 8-32x sublane padding in VMEM; acceptable
    # because chunks are bounded (~256 KiB raw).
    n = x1d.shape[0]
    itemsize = x1d.dtype.itemsize
    chunk = max(_LANE, (_RAGGED_CHUNK_BYTES // itemsize) // _LANE * _LANE)
    chunk = min(chunk, n)  # whole array in one (full-extent) block if it fits
    nbytes = n * itemsize
    spec = pl.BlockSpec((1, chunk), lambda i: (0, i))
    y2d = pl.pallas_call(
        _identity_copy_kernel,
        out_shape=jax.ShapeDtypeStruct((1, n), x1d.dtype),
        grid_spec=pltpu.PrefetchScalarGridSpec(
            num_scalar_prefetch=0,
            grid=(pl.cdiv(n, chunk),),
            in_specs=[spec],
            out_specs=spec,
        ),
        input_output_aliases={0: 0} if alias_input else {},
        cost_estimate=pl.CostEstimate(
            flops=0, transcendentals=0, bytes_accessed=2 * nbytes),
        compiler_params=pltpu.CompilerParams(
            dimension_semantics=("parallel",),
            vmem_limit_bytes=_VMEM_LIMIT_BYTES,
        ),
    )(x1d.reshape(1, n))
    return y2d.reshape(n)


def identity_copy(x, *, alias_input=False):
    """Materialize a fresh copy of x via a Pallas streaming-copy kernel.

    alias_input=True adds input_output_aliases={0: 0} so a donating caller can
    reuse the input HBM buffer instead of allocating a second one.
    """
    x = jnp.asarray(x)
    if x.size == 0:
        return x
    orig_shape = x.shape
    n = x.size
    itemsize = x.dtype.itemsize
    if n % _LANE == 0:
        R, C, rows = _choose_2d_layout(n, itemsize)
        y = _pallas_copy_2d(x.reshape(R, C), rows, alias_input=alias_input)
    else:
        y = _pallas_copy_ragged(x.reshape(n), alias_input=alias_input)
    return y.reshape(orig_shape)


class IdentityFirstStage:
    """JAX/Pallas port of ldm.models.autoencoder.IdentityFirstStage.

    forward/encode/decode/quantize are identities.  By default they return x
    directly (no HBM round trip — the highest-value optimization for a no-op);
    pass materialize=True to force a fresh buffer via the Pallas copy kernel.
    """

    def __init__(self, *args, vq_interface=False, materialize=False, **kwargs):
        self.vq_interface = vq_interface
        self.materialize = materialize

    def _identity(self, x):
        x = jnp.asarray(x)
        if not self.materialize or x.size == 0:
            return x
        return identity_copy(x)

    def encode(self, x, *args, **kwargs):
        return self._identity(x)

    def decode(self, x, *args, **kwargs):
        return self._identity(x)

    def quantize(self, x, *args, **kwargs):
        y = self._identity(x)
        if self.vq_interface:
            return (y, None, [None, None, None])
        return y

    def forward(self, x, *args, **kwargs):
        return self._identity(x)

    def __call__(self, x, *args, **kwargs):
        return self.forward(x, *args, **kwargs)


if __name__ == "__main__":
    key = jax.random.PRNGKey(0)
    k0, k1 = jax.random.split(key)

    # NCHW input consistent with LDM first-stage usage: batch=2, ch=4, 16x16.
    x = jax.random.normal(k0, (2, 4, 16, 16), dtype=jnp.float32)

    # Default path: pure bypass — no kernel, no HBM traffic.
    model = IdentityFirstStage(vq_interface=True)
    y = jax.block_until_ready(model(x))
    assert y.shape == x.shape and y.dtype == x.dtype
    assert bool(jnp.all(y == x))

    e = jax.block_until_ready(model.encode(x))
    d = jax.block_until_ready(model.decode(x))
    q, emb_loss, info = model.quantize(x)
    q = jax.block_until_ready(q)
    assert bool(jnp.all(e == x)) and bool(jnp.all(d == x)) and bool(jnp.all(q == x))
    assert emb_loss is None and info == [None, None, None]

    # Materialized path: exercises the Pallas streaming-copy kernel.
    model_mat = IdentityFirstStage(vq_interface=False, materialize=True)
    y_mat = jax.block_until_ready(model_mat(x))
    assert y_mat.shape == x.shape and y_mat.dtype == x.dtype
    assert bool(jnp.all(y_mat == x))

    # bf16 path (dtype-dependent sublane rounding: 16-row tiles).
    x_bf16 = x.astype(jnp.bfloat16)
    y_bf16 = jax.block_until_ready(identity_copy(x_bf16))
    assert y_bf16.dtype == jnp.bfloat16 and bool(jnp.all(y_bf16 == x_bf16))

    # Non-128-divisible element count exercises the bounded ragged path.
    x_odd = jax.random.normal(k1, (3, 5, 7), dtype=jnp.float32)
    y_odd = jax.block_until_ready(identity_copy(x_odd))
    assert y_odd.shape == x_odd.shape and bool(jnp.all(y_odd == x_odd))

    # Aliased copy (for donating callers); never read x_alias after the call.
    expected = jax.random.normal(k1, (8, 256), dtype=jnp.float32)
    x_alias = expected + 0.0  # distinct buffer with identical values
    y_alias = jax.block_until_ready(identity_copy(x_alias, alias_input=True))
    assert y_alias.shape == expected.shape and bool(jnp.all(y_alias == expected))

    print("KERNEL_OK")
</pallas_src>

<mosaic_0001>
module attributes {stable_mosaic.version = 11 : i64} {
  func.func @_identity_copy_kernel(%arg0: i32, %arg1: memref<8x256xf32, #tpu.memory_space<vmem>>, %arg2: memref<8x256xf32, #tpu.memory_space<vmem>>) attributes {dimension_semantics = [#tpu.dimension_semantics<parallel>], iteration_bounds = array<i64: 1>, scalar_prefetch = 0 : i64, scratch_operands = 0 : i64, tpu.core_type = #tpu.core_type<tc>, window_params = [{transform_indices = @transform_0, window_bounds = array<i64: 8, 256>}, {transform_indices = @transform_1, window_bounds = array<i64: 8, 256>}]} {
    %c0 = arith.constant 0 : index
    %c0_0 = arith.constant 0 : index
    %0 = vector.load %arg1[%c0, %c0_0] : memref<8x256xf32, #tpu.memory_space<vmem>>, vector<8x256xf32>
    %c0_1 = arith.constant 0 : index
    %c0_2 = arith.constant 0 : index
    %1 = vector.load %arg2[%c0_1, %c0_2] : memref<8x256xf32, #tpu.memory_space<vmem>>, vector<8x256xf32>
    tpu.vector_store %arg2[%c0_1, %c0_2], %0 {strides = array<i32>} : memref<8x256xf32, #tpu.memory_space<vmem>>, vector<8x256xf32>,
    return
  }
  func.func @transform_0(%arg0: i32) -> (i32, i32) {
    %c0_i32 = arith.constant 0 : i32
    %c0_i32_0 = arith.constant 0 : i32
    return %arg0, %c0_i32 : i32, i32
  }
  func.func @transform_1(%arg0: i32) -> (i32, i32) {
    %c0_i32 = arith.constant 0 : i32
    %c0_i32_0 = arith.constant 0 : i32
    return %arg0, %c0_i32 : i32, i32
  }
}

</mosaic_0001>

<bundles_post_ra>
// kernel: tpu_custom_call.1
= control target key start
LH: loop header
LB: loop body
LE: loop exit
PB: predicated region body
PF: predicated region fallthrough
CT: control target
= control target key end

     0   :  { %6 = vsyncpa [#allocation3], 0  ;;  %s104_s0 = inlined_call_operand.hbm [shape: f32[8,256], index: 0, kind: input, shape index: {}]   ;;  %s105_s1 = inlined_call_operand.hbm [shape: f32[8,256], index: 1, kind: output, shape index: {}]  }
   0x1   :  { %7 = vsyncpa [#allocation4], 0  ;;  %s86_s6 = smov [#allocation2]  }
   0x2   :  { %s14_s7 = sshll.u32 %s86_s6, 4  ;;  %s15_s7 = int_to_ptr.vmem [resolvable:$true] %s14_s7 }
   0x3   :  { %s50_s8 = scalar_lea.vmem %s15_s7, 256  ;;  %p55_p1 = scmp.lt.s32.totalorder %s15_s7, %s15_s7 }
   0x4   :  { %p51_p0 = scmp.ne.s32.totalorder %s15_s7, %s50_s8  ;;  %p56_p2 = scmp.lt.s32.totalorder %s50_s8, %s50_s8 }
   0x6   :  { %p57_p3 = por %p56_p2, %p55_p1 }
   0x8   :  { %p58_p4 = pnand %p57_p3, %p51_p0 }
   0xa   :  { %61 = shalt.err (!%p58_p4)
}
   0xb   :  { %17 = dma.hbm_to_vmem [thread:$0]  %s104_s0, 256, %s15_s7, [#allocation3]  }
   0xc   :  { %82 = dma.done.wait [#allocation3], 256  }
   0xd   :  { %83 = vsyncadd [#allocation3], 4294967040  ;;  %s87_s11 = smov [#allocation5]   ;;  %v21_v0 = vld [vmem:[#allocation2] sm:$0xff]  ;;  %v22_v1 = vld [vmem:[#allocation2 + $0x8] sm:$0xff] }
   0xe   :  { %s31_s12 = sshll.u32 %s87_s11, 4  ;;  %23 = vst [vmem:[#allocation5] sm:$0xff] %v21_v0  ;;  %24 = vst [vmem:[#allocation5 + $0x8] sm:$0xff] %v22_v1  ;;  %s32_s12 = int_to_ptr.vmem [resolvable:$true] %s31_s12 }
   0xf   :  { %s62_s13 = scalar_lea.vmem %s32_s12, 256  ;;  %p67_p6 = scmp.lt.s32.totalorder %s32_s12, %s32_s12 }
  0x10   :  { %p63_p5 = scmp.ne.s32.totalorder %s32_s12, %s62_s13  ;;  %p68_p7 = scmp.lt.s32.totalorder %s62_s13, %s62_s13 }
  0x12   :  { %p69_p8 = por %p68_p7, %p67_p6 }
  0x14   :  { %p70_p9 = pnand %p69_p8, %p63_p5 }
  0x16   :  { %73 = shalt.err (!%p70_p9)
}
  0x17   :  { %34 = dma.vmem_to_hbm [thread:$0]  %s32_s12, 256, %s105_s1, [#allocation4]  }
  0x18   :  { %84 = dma.done.wait [#allocation4], 256  }
  0x19   :  { %85 = vsyncadd [#allocation4], 4294967040 }
  0x1a   :  { %38 = vsyncpa [#allocation3], 1 }
  0x1b   :  { %39 = vsyncpa [#allocation4], 1 }

</bundles_post_ra>
